<compile_context>
chip_gen: v7x
topology: tpu7x:2x2x1
jax: 0.10.0
libtpu: 0.0.40
codegen_flags: <defaults>
</compile_context>

<pallas_src>
import math

import jax
import jax.numpy as jnp
from jax.experimental import pallas as pl
from jax.experimental.pallas import tpu as pltpu

_SUBLANE = 8


# ---------------------------------------------------------------------------
# Kernel body
# ---------------------------------------------------------------------------
def _rope_kernel(x_ref, cos_ref, sin_e_ref, sin_o_ref, o_ref):
    """x_ref / o_ref: (B_blk, T, L) tiles; tables: (T, L) batch-invariant tiles.

    out[2i]   = x[2i]*cos_i - x[2i+1]*sin_i
    out[2i+1] = x[2i]*sin_i + x[2i+1]*cos_i

    realised with no per-lane select:
        out = x*cos + roll(x, -1)*sin_even + roll(x, +1)*sin_odd
    where sin_even holds (-sin) at even lanes / 0 at odd lanes and sin_odd
    holds (+sin) at odd lanes / 0 at even lanes.  The wrap-around lane of each
    roll lands on a 0 table entry, so it never contributes.
    """
    x = x_ref[...]
    lanes = x.shape[-1]
    last = x.ndim - 1
    x_next = pltpu.roll(x, shift=lanes - 1, axis=last)   # x[j+1] at lane j
    x_prev = pltpu.roll(x, shift=1, axis=last)           # x[j-1] at lane j
    out = (x * cos_ref[...]
           + x_next * sin_e_ref[...]
           + x_prev * sin_o_ref[...])
    o_ref[...] = out.astype(o_ref.dtype)


# ---------------------------------------------------------------------------
# One-time table construction (hoisted out of the forward hot path)
# ---------------------------------------------------------------------------
def make_rope_tables(seq_len, d_model, div_term):
    """Three float32 (seq_len, d_model) tables with the pair interleave, sin
    sign and even/odd parity already folded in.  Build once; reuse per call."""
    positions = jnp.arange(seq_len, dtype=jnp.float32)[:, None]          # (S, 1)
    angles = positions * div_term[None, :].astype(jnp.float32)           # (S, H)
    cos_h = jnp.cos(angles)
    sin_h = jnp.sin(angles)
    zeros = jnp.zeros_like(sin_h)
    cos_t = jnp.repeat(cos_h, 2, axis=-1)                                # (S, D)
    sin_even_t = jnp.stack([-sin_h, zeros], axis=-1).reshape(seq_len, d_model)
    sin_odd_t = jnp.stack([zeros, sin_h], axis=-1).reshape(seq_len, d_model)
    return cos_t, sin_even_t, sin_odd_t


# ---------------------------------------------------------------------------
# Tiling heuristics
# ---------------------------------------------------------------------------
def _vmem_capacity_bytes():
    """Generation-aware VMEM capacity; conservative fallback if unavailable."""
    try:
        cap = getattr(pltpu.get_tpu_info(), "vmem_capacity_bytes", None)
        if cap:
            return int(cap)
    except Exception:
        pass
    return 64 * 1024 * 1024   # v7x-sized fallback — safe on every generation


def _fold_factor(seq_len, d_model):
    """How many sequence rows to fold into lanes so the last dim is 128-dense."""
    if d_model >= 128 or d_model % 128 == 0:
        return 1
    k = 128 // math.gcd(d_model, 128)        # smallest k with (k*D) % 128 == 0
    if seq_len % k == 0 and k * d_model <= 1024:
        return k
    return 1                                  # correctness first: no folding


def _choose_tiling(batch, s_fold, lanes, x_bytes, tbl_bytes, vmem_budget,
                   max_tile=2048):
    """Pick (batch_block, seq_tile) so double-buffered blocks fit the budget."""

    def per_row_bytes(b_blk):
        # x + out blocks carry b_blk rows each; the 3 f32 tables carry one row
        # each; everything is double-buffered by the BlockSpec pipeline.
        return 2 * 2 * b_blk * lanes * x_bytes + 2 * 3 * lanes * tbl_bytes

    # Largest divisor of `batch` for which a minimal tile still fits.
    b_blk = batch
    min_rows = max(1, min(s_fold, _SUBLANE))
    while b_blk > 1 and per_row_bytes(b_blk) * min_rows > vmem_budget:
        b_blk -= 1
        while batch % b_blk:
            b_blk -= 1

    t = max(1, vmem_budget // per_row_bytes(b_blk))
    t = min(t, max_tile, s_fold)
    if t < s_fold:
        t = max(_SUBLANE, (t // _SUBLANE) * _SUBLANE)
        # Prefer a tile dividing s_fold, but never below half the budgeted
        # tile (one ragged tail block is cheaper than a collapsed tile).
        for cand in range(t, max(_SUBLANE, t // 2) - 1, -_SUBLANE):
            if s_fold % cand == 0:
                t = cand
                break

    # v7x has 2 TensorCores: avoid a 1-step grid when there is enough sequence
    # to split (harmless one extra step on single-TC v5e/v6e).
    if pl.cdiv(s_fold, t) * pl.cdiv(batch, b_blk) == 1 and s_fold >= 2 * _SUBLANE:
        t = max(_SUBLANE, ((s_fold // 2) // _SUBLANE) * _SUBLANE)

    return b_blk, min(t, s_fold)


# ---------------------------------------------------------------------------
# Forward
# ---------------------------------------------------------------------------
def rope_forward(x, cos_t, sin_even_t, sin_odd_t):
    """x: (B, S, D); tables: (>=S, D) float32 from make_rope_tables."""
    B, S, D = x.shape
    assert D % 2 == 0, "d_model must be even"
    if cos_t.shape[0] != S:                      # max_len buffer semantics
        cos_t, sin_even_t, sin_odd_t = (a[:S] for a in
                                        (cos_t, sin_even_t, sin_odd_t))

    # Fold k sequence rows into the lane axis so blocks are lane-dense even
    # for small per-head D (free metadata reshapes).
    k = _fold_factor(S, D)
    s_fold, lanes = S // k, k * D
    x_f = x.reshape(B, s_fold, lanes)
    cos_f = cos_t.reshape(s_fold, lanes)
    sin_e_f = sin_even_t.reshape(s_fold, lanes)
    sin_o_f = sin_odd_t.reshape(s_fold, lanes)

    vmem_cap = _vmem_capacity_bytes()
    vmem_budget = min(vmem_cap // 3, 40 * 1024 * 1024)       # ~21 MiB on v7x
    vmem_limit = int(min(vmem_cap * 3 // 4, 96 * 1024 * 1024))

    x_bytes = jnp.dtype(x.dtype).itemsize
    tbl_bytes = jnp.dtype(cos_f.dtype).itemsize
    b_blk, t = _choose_tiling(B, s_fold, lanes, x_bytes, tbl_bytes, vmem_budget)

    # Batch innermost: the table block index depends only on the seq axis, so
    # each table tile is DMA'd once per seq tile and reused across batch steps.
    grid = (pl.cdiv(s_fold, t), pl.cdiv(B, b_blk))

    x_spec = pl.BlockSpec((b_blk, t, lanes), lambda s, b: (b, s, 0))
    tbl_spec = pl.BlockSpec((t, lanes), lambda s, b: (s, 0))
    out_spec = pl.BlockSpec((b_blk, t, lanes), lambda s, b: (b, s, 0))

    out = pl.pallas_call(
        _rope_kernel,
        out_shape=jax.ShapeDtypeStruct((B, s_fold, lanes), x.dtype),
        grid_spec=pltpu.PrefetchScalarGridSpec(
            num_scalar_prefetch=0,
            grid=grid,
            in_specs=[x_spec, tbl_spec, tbl_spec, tbl_spec],
            out_specs=out_spec,
        ),
        compiler_params=pltpu.CompilerParams(
            dimension_semantics=("parallel", "parallel"),
            vmem_limit_bytes=vmem_limit,
        ),
    )(x_f, cos_f, sin_e_f, sin_o_f)

    return out.reshape(B, S, D)


rope_forward_jit = jax.jit(rope_forward)


# ---------------------------------------------------------------------------
# Pure-JAX reference (mirrors the PyTorch module)
# ---------------------------------------------------------------------------
def rope_reference(x, div_term):
    B, S, D = x.shape
    positions = jnp.arange(S, dtype=jnp.float32)[:, None]
    angles = positions * div_term[None, :]
    c = jnp.cos(angles)
    s = jnp.sin(angles)
    xp = x.reshape(B, S, D // 2, 2)
    xe, xo = xp[..., 0], xp[..., 1]
    re = xe * c - xo * s
    ro = xe * s + xo * c
    return jnp.stack([re, ro], axis=-1).reshape(B, S, D)


if __name__ == "__main__":
    d_model = 32
    batch = 2
    seq_len = 8

    # Matches the PyTorch buffer:
    # div_term = exp(arange(0, d_model, 2) * -(log(10000) / d_model))
    div_term = jnp.exp(
        jnp.arange(0, d_model, 2, dtype=jnp.float32)
        * -(jnp.log(jnp.float32(10000.0)) / d_model)
    )

    key = jax.random.PRNGKey(0)
    x = jax.random.normal(key, (batch, seq_len, d_model), dtype=jnp.float32)

    # Tables built once (hoisted out of the per-call hot path).
    cos_t, sin_even_t, sin_odd_t = make_rope_tables(seq_len, d_model, div_term)

    out = rope_forward_jit(x, cos_t, sin_even_t, sin_odd_t)
    out = jax.block_until_ready(out)

    ref = rope_reference(x, div_term)
    assert out.shape == (batch, seq_len, d_model)
    assert jnp.allclose(out, ref, atol=1e-5, rtol=1e-5)

    print("KERNEL_OK")
</pallas_src>

<mosaic_0001>
module attributes {stable_mosaic.version = 11 : i64} {
  func.func @_rope_kernel(%arg0: i32, %arg1: i32, %arg2: memref<2x2x128xf32, #tpu.memory_space<vmem>>, %arg3: memref<2x128xf32, #tpu.memory_space<vmem>>, %arg4: memref<2x128xf32, #tpu.memory_space<vmem>>, %arg5: memref<2x128xf32, #tpu.memory_space<vmem>>, %arg6: memref<2x2x128xf32, #tpu.memory_space<vmem>>) attributes {dimension_semantics = [#tpu.dimension_semantics<parallel>, #tpu.dimension_semantics<parallel>], iteration_bounds = array<i64: 1, 1>, scalar_prefetch = 0 : i64, scratch_operands = 0 : i64, tpu.core_type = #tpu.core_type<tc>, window_params = [{transform_indices = @transform_0, window_bounds = array<i64: 2, 2, 128>}, {transform_indices = @transform_1, window_bounds = array<i64: 2, 128>}, {transform_indices = @transform_2, window_bounds = array<i64: 2, 128>}, {transform_indices = @transform_3, window_bounds = array<i64: 2, 128>}, {transform_indices = @transform_4, window_bounds = array<i64: 2, 2, 128>}]} {
    %c0 = arith.constant 0 : index
    %c0_0 = arith.constant 0 : index
    %c0_1 = arith.constant 0 : index
    %0 = vector.load %arg2[%c0, %c0_0, %c0_1] : memref<2x2x128xf32, #tpu.memory_space<vmem>>, vector<2x2x128xf32>
    %c127_i32 = arith.constant 127 : i32
    %1 = tpu.dynamic_rotate %0 by %c127_i32 dim 2 : vector<2x2x128xf32>, i32 -> vector<2x2x128xf32>
    %c1_i32 = arith.constant 1 : i32
    %2 = tpu.dynamic_rotate %0 by %c1_i32 dim 2 : vector<2x2x128xf32>, i32 -> vector<2x2x128xf32>
    %c0_2 = arith.constant 0 : index
    %c0_3 = arith.constant 0 : index
    %3 = vector.load %arg3[%c0_2, %c0_3] : memref<2x128xf32, #tpu.memory_space<vmem>>, vector<2x128xf32>
    %4 = vector.shape_cast %3 : vector<2x128xf32> to vector<1x2x128xf32>
    %5 = vector.broadcast %4 : vector<1x2x128xf32> to vector<2x2x128xf32>
    %6 = arith.mulf %0, %5 : vector<2x2x128xf32>
    %c0_4 = arith.constant 0 : index
    %c0_5 = arith.constant 0 : index
    %7 = vector.load %arg4[%c0_4, %c0_5] : memref<2x128xf32, #tpu.memory_space<vmem>>, vector<2x128xf32>
    %8 = vector.shape_cast %7 : vector<2x128xf32> to vector<1x2x128xf32>
    %9 = vector.broadcast %8 : vector<1x2x128xf32> to vector<2x2x128xf32>
    %10 = arith.mulf %1, %9 : vector<2x2x128xf32>
    %11 = arith.addf %6, %10 : vector<2x2x128xf32>
    %c0_6 = arith.constant 0 : index
    %c0_7 = arith.constant 0 : index
    %12 = vector.load %arg5[%c0_6, %c0_7] : memref<2x128xf32, #tpu.memory_space<vmem>>, vector<2x128xf32>
    %13 = vector.shape_cast %12 : vector<2x128xf32> to vector<1x2x128xf32>
    %14 = vector.broadcast %13 : vector<1x2x128xf32> to vector<2x2x128xf32>
    %15 = arith.mulf %2, %14 : vector<2x2x128xf32>
    %16 = arith.addf %11, %15 : vector<2x2x128xf32>
    %c0_8 = arith.constant 0 : index
    %c0_9 = arith.constant 0 : index
    %c0_10 = arith.constant 0 : index
    %17 = vector.load %arg6[%c0_8, %c0_9, %c0_10] : memref<2x2x128xf32, #tpu.memory_space<vmem>>, vector<2x2x128xf32>
    tpu.vector_store %arg6[%c0_8, %c0_9, %c0_10], %16 {strides = array<i32>} : memref<2x2x128xf32, #tpu.memory_space<vmem>>, vector<2x2x128xf32>,
    return
  }
  func.func @transform_0(%arg0: i32, %arg1: i32) -> (i32, i32, i32) {
    %c0_i32 = arith.constant 0 : i32
    %c0_i32_0 = arith.constant 0 : i32
    return %arg1, %arg0, %c0_i32 : i32, i32, i32
  }
  func.func @transform_1(%arg0: i32, %arg1: i32) -> (i32, i32) {
    %c0_i32 = arith.constant 0 : i32
    %c0_i32_0 = arith.constant 0 : i32
    return %arg0, %c0_i32 : i32, i32
  }
  func.func @transform_2(%arg0: i32, %arg1: i32) -> (i32, i32) {
    %c0_i32 = arith.constant 0 : i32
    %c0_i32_0 = arith.constant 0 : i32
    return %arg0, %c0_i32 : i32, i32
  }
  func.func @transform_3(%arg0: i32, %arg1: i32) -> (i32, i32) {
    %c0_i32 = arith.constant 0 : i32
    %c0_i32_0 = arith.constant 0 : i32
    return %arg0, %c0_i32 : i32, i32
  }
  func.func @transform_4(%arg0: i32, %arg1: i32) -> (i32, i32, i32) {
    %c0_i32 = arith.constant 0 : i32
    %c0_i32_0 = arith.constant 0 : i32
    return %arg1, %arg0, %c0_i32 : i32, i32, i32
  }
}

</mosaic_0001>

<bundles_post_ra>
// kernel: rope_forward.1
= control target key start
LH: loop header
LB: loop body
LE: loop exit
PB: predicated region body
PF: predicated region fallthrough
CT: control target
= control target key end

     0   :  { %s48_s17 = smov 127   ;;  %s49_s18 = smov 1   ;;  %s96_s0 = inlined_call_operand.vmem [shape: f32[2,2,128], index: 0, kind: input, shape index: {}]   ;;  %s97_s1 = inlined_call_operand.vmem [shape: f32[2,128], index: 1, kind: input, shape index: {}]   ;;  %s98_s2 = inlined_call_operand.vmem [shape: f32[2,128], index: 2, kind: input, shape index: {}]   ;;  %s99_s3 = inlined_call_operand.vmem [shape: f32[2,128], index: 3, kind: input, shape index: {}]   ;;  %s100_s4 = inlined_call_operand.vmem [shape: f32[2,2,128], index: 4, kind: output, shape index: {}]  }
   0x1   :  { %v17_v0 = vld [vmem:[%s96_s0] sm:$0x3]  ;;  %v18_v1 = vld [vmem:[%s96_s0 + $0x2] sm:$0x3] }
   0x2   :  { %19 = vrot.lane.b32.xlu0 %v17_v0, %s48_s17  ;;  %23 = vrot.lane.b32.xlu1 %v17_v0, %s49_s18  ;;  %v27_v2 = vld [vmem:[%s97_s1] sm:$0x3] }
   0x3   :  { %v30_v3 = vld [vmem:[%s98_s2] sm:$0x3]  ;;  %v28_v5 = vmul.f32 %v27_v2, %v17_v0  ;;  %v29_v10 = vmul.f32 %v27_v2, %v18_v1 }
   0x4   :  { %v35_v4 = vld [vmem:[%s99_s3] sm:$0x3] }
   0x6   :  { %21 = vrot.lane.b32.xlu0 %v18_v1, %s48_s17  ;;  %25 = vrot.lane.b32.xlu1 %v18_v1, %s49_s18 }
  0x74   :  { %v20_v6 = vpop.permute.xlu0 %19  ;;  %v24_v7 = vpop.permute.xlu1 %23 }
  0x75   :  { %v31_v8 = vmul.f32 %v30_v3, %v20_v6  ;;  %v36_v9 = vmul.f32 %v35_v4, %v24_v7 }
  0x77   :  { %v33_v11 = vadd.f32 %v31_v8, %v28_v5 }
  0x78   :  { %v22_v12 = vpop.permute.xlu0 %21  ;;  %v26_v13 = vpop.permute.xlu1 %25 }
  0x79   :  { %v38_v14 = vadd.f32 %v36_v9, %v33_v11  ;;  %v32_v15 = vmul.f32 %v30_v3, %v22_v12  ;;  %v37_v16 = vmul.f32 %v35_v4, %v26_v13 }
  0x7b   :  { %40 = vst [vmem:[%s100_s4] sm:$0x3] %v38_v14  ;;  %v34_v17 = vadd.f32 %v32_v15, %v29_v10 }
  0x7d   :  { %v39_v18 = vadd.f32 %v37_v16, %v34_v17 }
  0x7f   :  { %41 = vst [vmem:[%s100_s4 + $0x2] sm:$0x3] %v39_v18 }

</bundles_post_ra>
